<compile_context>
chip_gen: v7x
topology: tpu7x:2x2x1
jax: 0.10.0
libtpu: 0.0.40
codegen_flags: <defaults>
</compile_context>

<pallas_src>
import functools

import jax
import jax.numpy as jnp
from jax.experimental import pallas as pl
from jax.experimental.pallas import tpu as pltpu

EPS1 = 0.01 ** 2
EPS2 = 0.03 ** 2

# Conservative per-block-element VMEM estimate: 3 I/O arrays x 2 (double
# buffer) x 4 B plus ~14 simultaneously-live full-plane f32 temporaries in the
# straight-line kernel body.
_BYTES_PER_BLOCK_ELEM = 96


def _ssim_kernel(pred_ref, targ_ref, out_ref, *, plane_h: int):
    # Block = K whole (plane_h, W) image planes, flattened to (K*plane_h, W).
    KH, W = out_ref.shape
    H = plane_h

    # Border-correction sign planes, computed once (JAX does not CSE
    # broadcast_in_dim): +1 on plane-first rows / first column, -1 on
    # plane-last rows / last column, 0 elsewhere.
    rows = jax.lax.broadcasted_iota(jnp.int32, (KH, W), 0) % H
    cols = jax.lax.broadcasted_iota(jnp.int32, (KH, W), 1)
    one = jnp.float32(1.0)
    zero = jnp.float32(0.0)
    row_sign = jnp.where(rows == 0, one, zero) - jnp.where(rows == H - 1, one, zero)
    col_sign = jnp.where(cols == 0, one, zero) - jnp.where(cols == W - 1, one, zero)

    def pool3x(a):
        """Separable 3x3 *sum* (9x the avg pool) with exclusive-reflect pad.

        Vertical pass: up[i] = a[i-1], dn[i] = a[i+1] (wrapping rotates).
        Interior rows get a[i-1] + a[i] + a[i+1] directly.  At a plane-first
        row the reflect pad wants a[i] + 2*a[i+1]; the wrapped sum gave
        a[i] + a[i+1] + <wrapped row>, so the fix is +(dn - up) there; at a
        plane-last row it is -(dn - up).  The fix only reads dn/up at that
        same row, so it is exact even when the wrapped-in row belongs to the
        neighbouring plane of the flattened block.  Horizontal pass is the
        identical construction on the lane axis.
        """
        up = pltpu.roll(a, shift=1, axis=0)        # a[i-1]
        dn = pltpu.roll(a, shift=KH - 1, axis=0)   # a[i+1]
        s = a + up + dn + (dn - up) * row_sign
        lf = pltpu.roll(s, shift=1, axis=1)        # s[:, j-1]
        rt = pltpu.roll(s, shift=W - 1, axis=1)    # s[:, j+1]
        return s + lf + rt + (rt - lf) * col_sign

    x = pred_ref[...].astype(jnp.float32)
    y = targ_ref[...].astype(jnp.float32)

    sx = pool3x(x)
    sy = pool3x(y)
    sxx = pool3x(x * x)
    syy = pool3x(y * y)
    sxy = pool3x(x * y)

    # Work directly with the raw 3x3 sums S = 9 * pool; num/den is a ratio so
    # the common 1/81^2 cancels once the eps constants are scaled by 81:
    #   2*mu_x*mu_y       -> 2*Sx*Sy               / 81
    #   2*sig_xy          -> 18*Sxy - 2*Sx*Sy      / 81
    #   mu_x^2 + mu_y^2   -> Sx^2 + Sy^2           / 81
    #   sig_x + sig_y     -> 9*(Sxx+Syy) - Sx^2 - Sy^2 / 81
    e1 = jnp.float32(81.0 * EPS1)
    e2 = jnp.float32(81.0 * EPS2)
    sxsy = sx * sy
    two_sxsy = sxsy + sxsy
    sq = sx * sx + sy * sy
    num = (two_sxsy + e1) * (18.0 * sxy - two_sxsy + e2)
    den = (sq + e1) * (9.0 * (sxx + syy) - sq + e2)

    # den >= (81*eps1)*(81*eps2) > 0.  EUP approx reciprocal + one Newton step
    # keeps the divide off the VALU slot at ~f32 accuracy.
    r = pl.reciprocal(den, approx=True)
    r = r * (2.0 - den * r)
    loss = jnp.clip((1.0 - num * r) * 0.5, 0.0, 1.0)
    out_ref[...] = loss.astype(out_ref.dtype)


def _vmem_plan():
    """Returns (block_budget_bytes, vmem_limit_bytes, min_grid_steps, prefer_even)."""
    try:
        vmem_cap = int(pltpu.get_tpu_info().vmem_capacity_bytes)
    except Exception:
        vmem_cap = 64 * 1024 * 1024  # conservative fallback: assume smallest (v7x)
    if vmem_cap >= 100 * 1024 * 1024:
        # v5e / v6e: 128 MiB VMEM, one TensorCore per chip.  Use big blocks
        # (fewer ~0.35 us grid steps, bigger contiguous DMAs); keep >= 2 steps
        # so the auto-pipeline can overlap DMA with compute.
        return 64 * 1024 * 1024, 96 * 1024 * 1024, 2, False
    # v7x: 64 MiB VMEM, two TensorCores share the "parallel" grid axis.  Keep
    # blocks small and require an even, >= 4-step grid so both cores stay busy
    # and pipelined, with headroom under the 64 MiB physical VMEM.
    return 24 * 1024 * 1024, 40 * 1024 * 1024, 4, True


def _choose_planes_per_step(num_planes, H, W, block_budget, min_steps, prefer_even):
    """Pick K = image planes per grid step under the chip's VMEM budget."""
    max_elems = max(block_budget // _BYTES_PER_BLOCK_ELEM, 1)
    divisors = [k for k in range(1, num_planes + 1) if num_planes % k == 0]
    fits = [k for k in divisors if k * H * W <= max_elems] or [1]
    # Prefer sublane-aligned blocks (first block dim % 8 == 0) unless the
    # block already covers the whole flattened array.
    aligned = [k for k in fits if (k * H) % 8 == 0 or k == num_planes]
    if aligned:
        fits = aligned

    def score(k):
        steps = num_planes // k
        return (
            steps >= min_steps,                        # enough steps to pipeline/shard
            (steps % 2 == 0) if prefer_even else True,  # even split across 2 TCs (v7x)
            k,                                          # then: biggest block
        )

    return max(fits, key=score)


def ssim_error(pred: jax.Array, target: jax.Array) -> jax.Array:
    """pred, target: (B, C, H, W). Returns the SSIM error of the same shape."""
    assert pred.shape == target.shape
    B, C, H, W = pred.shape
    assert H >= 2 and W >= 2, "ReflectionPad2d(1) requires H, W >= 2"

    P = B * C
    block_budget, vmem_limit, min_steps, prefer_even = _vmem_plan()
    K = _choose_planes_per_step(P, H, W, block_budget, min_steps, prefer_even)
    # TODO(synk): for tiny P on v7x (P < 4) or planes too large for a single
    # block, additionally split H across a second "parallel" grid axis with a
    # 1-row halo so both TensorCores stay busy; typical monodepth2 shapes do
    # not need it.

    # Flatten whole planes onto the sublane axis: each grid step processes K
    # complete (H, W) planes as one straight-line (K*H, W) body.
    pred_f = pred.reshape(P * H, W)
    targ_f = target.reshape(P * H, W)

    spec = pl.BlockSpec((K * H, W), lambda i: (i, 0))
    out = pl.pallas_call(
        functools.partial(_ssim_kernel, plane_h=H),
        out_shape=jax.ShapeDtypeStruct((P * H, W), pred.dtype),
        grid_spec=pltpu.PrefetchScalarGridSpec(
            num_scalar_prefetch=0,
            grid=(P // K,),
            in_specs=[spec, spec],
            out_specs=spec,
        ),
        compiler_params=pltpu.CompilerParams(
            dimension_semantics=("parallel",),
            vmem_limit_bytes=vmem_limit,
        ),
    )(pred_f, targ_f)
    return out.reshape(B, C, H, W)


def _ssim_ref(pred, target):
    # Pure-JAX reference (matches the PyTorch module).
    def refl(a):
        return jnp.pad(a, ((0, 0), (0, 0), (1, 1), (1, 1)), mode="reflect")

    def pool(a):
        acc = jnp.zeros_like(a[:, :, 1:-1, 1:-1])
        H, W = acc.shape[-2:]
        for di in range(3):
            for dj in range(3):
                acc = acc + a[:, :, di:di + H, dj:dj + W]
        return acc / 9.0

    x, y = refl(pred), refl(target)
    mu_x, mu_y = pool(x), pool(y)
    sig_x = pool(x * x) - mu_x * mu_x
    sig_y = pool(y * y) - mu_y * mu_y
    sig_xy = pool(x * y) - mu_x * mu_y
    num = (2 * mu_x * mu_y + EPS1) * (2 * sig_xy + EPS2)
    den = (mu_x ** 2 + mu_y ** 2 + EPS1) * (sig_x + sig_y + EPS2)
    return jnp.clip((1 - num / den) / 2, 0.0, 1.0)


if __name__ == "__main__":
    key = jax.random.PRNGKey(0)
    k1, k2 = jax.random.split(key)
    # Small, image-like shapes; W chosen lane-dense (multiple of 128).
    B, C, H, W = 2, 4, 16, 128
    pred = jax.random.uniform(k1, (B, C, H, W), dtype=jnp.float32)
    target = jax.random.uniform(k2, (B, C, H, W), dtype=jnp.float32)

    out = jax.block_until_ready(ssim_error(pred, target))
    ref = _ssim_ref(pred, target)
    assert out.shape == (B, C, H, W)
    # EUP approx reciprocal (+1 Newton step) and the 81x-rescaled num/den
    # perturb low-order bits only; not bit-exact vs torch's exact divide.
    err = float(jnp.max(jnp.abs(out - ref)))
    assert err < 2e-4, f"max abs err {err}"
    print("KERNEL_OK")
</pallas_src>

<mosaic_0001>
module attributes {stable_mosaic.version = 11 : i64} {
  func.func @_ssim_kernel(%arg0: i32, %arg1: memref<32x128xf32, #tpu.memory_space<vmem>>, %arg2: memref<32x128xf32, #tpu.memory_space<vmem>>, %arg3: memref<32x128xf32, #tpu.memory_space<vmem>>) attributes {dimension_semantics = [#tpu.dimension_semantics<parallel>], iteration_bounds = array<i64: 4>, scalar_prefetch = 0 : i64, scratch_operands = 0 : i64, tpu.core_type = #tpu.core_type<tc>, window_params = [{transform_indices = @transform_0, window_bounds = array<i64: 32, 128>}, {transform_indices = @transform_1, window_bounds = array<i64: 32, 128>}, {transform_indices = @transform_2, window_bounds = array<i64: 32, 128>}]} {
    %0 = tpu.iota {dimensions = array<i32: 0>} : vector<32x128xi32>
    %c16_i32 = arith.constant 16 : i32
    %c0_i32 = arith.constant 0 : i32
    %1 = arith.cmpi eq, %c16_i32, %c0_i32 : i32
    %c1_i32 = arith.constant 1 : i32
    %2 = arith.select %1, %c1_i32, %c16_i32 : i32
    %3 = vector.broadcast %2 : i32 to vector<32x128xi32>
    %4 = arith.remsi %0, %3 : vector<32x128xi32>
    %c0_i32_0 = arith.constant 0 : i32
    %5 = vector.broadcast %c0_i32_0 : i32 to vector<32x128xi32>
    %6 = arith.cmpi ne, %4, %5 : vector<32x128xi32>
    %c0_i32_1 = arith.constant 0 : i32
    %7 = vector.broadcast %c0_i32_1 : i32 to vector<32x128xi32>
    %8 = arith.cmpi slt, %4, %7 : vector<32x128xi32>
    %c0_i32_2 = arith.constant 0 : i32
    %9 = arith.cmpi slt, %2, %c0_i32_2 : i32
    %10 = vector.broadcast %9 : i1 to vector<32x128xi1>
    %11 = vector.broadcast %10 : vector<32x128xi1> to vector<32x128xi1>
    %12 = arith.xori %8, %11 : vector<32x128xi1>
    %13 = arith.andi %12, %6 : vector<32x128xi1>
    %14 = vector.broadcast %2 : i32 to vector<32x128xi32>
    %15 = arith.addi %4, %14 : vector<32x128xi32>
    %16 = arith.select %13, %15, %4 : vector<32x128xi1>, vector<32x128xi32>
    %17 = tpu.iota {dimensions = array<i32: 1>} : vector<32x128xi32>
    %c0_i32_3 = arith.constant 0 : i32
    %18 = vector.broadcast %c0_i32_3 : i32 to vector<32x128xi32>
    %19 = arith.cmpi eq, %16, %18 : vector<32x128xi32>
    %cst = arith.constant 1.000000e+00 : f32
    %cst_4 = arith.constant 0.000000e+00 : f32
    %20 = vector.broadcast %cst : f32 to vector<32x128xf32>
    %21 = vector.broadcast %cst_4 : f32 to vector<32x128xf32>
    %22 = arith.select %19, %20, %21 : vector<32x128xi1>, vector<32x128xf32>
    %c15_i32 = arith.constant 15 : i32
    %23 = vector.broadcast %c15_i32 : i32 to vector<32x128xi32>
    %24 = arith.cmpi eq, %16, %23 : vector<32x128xi32>
    %cst_5 = arith.constant 1.000000e+00 : f32
    %cst_6 = arith.constant 0.000000e+00 : f32
    %25 = vector.broadcast %cst_5 : f32 to vector<32x128xf32>
    %26 = vector.broadcast %cst_6 : f32 to vector<32x128xf32>
    %27 = arith.select %24, %25, %26 : vector<32x128xi1>, vector<32x128xf32>
    %28 = arith.subf %22, %27 : vector<32x128xf32>
    %c0_i32_7 = arith.constant 0 : i32
    %29 = vector.broadcast %c0_i32_7 : i32 to vector<32x128xi32>
    %30 = arith.cmpi eq, %17, %29 : vector<32x128xi32>
    %cst_8 = arith.constant 1.000000e+00 : f32
    %cst_9 = arith.constant 0.000000e+00 : f32
    %31 = vector.broadcast %cst_8 : f32 to vector<32x128xf32>
    %32 = vector.broadcast %cst_9 : f32 to vector<32x128xf32>
    %33 = arith.select %30, %31, %32 : vector<32x128xi1>, vector<32x128xf32>
    %c127_i32 = arith.constant 127 : i32
    %34 = vector.broadcast %c127_i32 : i32 to vector<32x128xi32>
    %35 = arith.cmpi eq, %17, %34 : vector<32x128xi32>
    %cst_10 = arith.constant 1.000000e+00 : f32
    %cst_11 = arith.constant 0.000000e+00 : f32
    %36 = vector.broadcast %cst_10 : f32 to vector<32x128xf32>
    %37 = vector.broadcast %cst_11 : f32 to vector<32x128xf32>
    %38 = arith.select %35, %36, %37 : vector<32x128xi1>, vector<32x128xf32>
    %39 = arith.subf %33, %38 : vector<32x128xf32>
    %c0 = arith.constant 0 : index
    %c0_12 = arith.constant 0 : index
    %40 = vector.load %arg1[%c0, %c0_12] : memref<32x128xf32, #tpu.memory_space<vmem>>, vector<32x128xf32>
    %c0_13 = arith.constant 0 : index
    %c0_14 = arith.constant 0 : index
    %41 = vector.load %arg2[%c0_13, %c0_14] : memref<32x128xf32, #tpu.memory_space<vmem>>, vector<32x128xf32>
    %c1_i32_15 = arith.constant 1 : i32
    %42 = tpu.dynamic_rotate %40 by %c1_i32_15 dim 0 : vector<32x128xf32>, i32 -> vector<32x128xf32>
    %c31_i32 = arith.constant 31 : i32
    %43 = tpu.dynamic_rotate %40 by %c31_i32 dim 0 : vector<32x128xf32>, i32 -> vector<32x128xf32>
    %44 = arith.addf %40, %42 : vector<32x128xf32>
    %45 = arith.addf %44, %43 : vector<32x128xf32>
    %46 = arith.subf %43, %42 : vector<32x128xf32>
    %47 = arith.mulf %46, %28 : vector<32x128xf32>
    %48 = arith.addf %45, %47 : vector<32x128xf32>
    %c1_i32_16 = arith.constant 1 : i32
    %49 = tpu.dynamic_rotate %48 by %c1_i32_16 dim 1 : vector<32x128xf32>, i32 -> vector<32x128xf32>
    %c127_i32_17 = arith.constant 127 : i32
    %50 = tpu.dynamic_rotate %48 by %c127_i32_17 dim 1 : vector<32x128xf32>, i32 -> vector<32x128xf32>
    %51 = arith.addf %48, %49 : vector<32x128xf32>
    %52 = arith.addf %51, %50 : vector<32x128xf32>
    %53 = arith.subf %50, %49 : vector<32x128xf32>
    %54 = arith.mulf %53, %39 : vector<32x128xf32>
    %55 = arith.addf %52, %54 : vector<32x128xf32>
    %c1_i32_18 = arith.constant 1 : i32
    %56 = tpu.dynamic_rotate %41 by %c1_i32_18 dim 0 : vector<32x128xf32>, i32 -> vector<32x128xf32>
    %c31_i32_19 = arith.constant 31 : i32
    %57 = tpu.dynamic_rotate %41 by %c31_i32_19 dim 0 : vector<32x128xf32>, i32 -> vector<32x128xf32>
    %58 = arith.addf %41, %56 : vector<32x128xf32>
    %59 = arith.addf %58, %57 : vector<32x128xf32>
    %60 = arith.subf %57, %56 : vector<32x128xf32>
    %61 = arith.mulf %60, %28 : vector<32x128xf32>
    %62 = arith.addf %59, %61 : vector<32x128xf32>
    %c1_i32_20 = arith.constant 1 : i32
    %63 = tpu.dynamic_rotate %62 by %c1_i32_20 dim 1 : vector<32x128xf32>, i32 -> vector<32x128xf32>
    %c127_i32_21 = arith.constant 127 : i32
    %64 = tpu.dynamic_rotate %62 by %c127_i32_21 dim 1 : vector<32x128xf32>, i32 -> vector<32x128xf32>
    %65 = arith.addf %62, %63 : vector<32x128xf32>
    %66 = arith.addf %65, %64 : vector<32x128xf32>
    %67 = arith.subf %64, %63 : vector<32x128xf32>
    %68 = arith.mulf %67, %39 : vector<32x128xf32>
    %69 = arith.addf %66, %68 : vector<32x128xf32>
    %70 = arith.mulf %40, %40 : vector<32x128xf32>
    %c1_i32_22 = arith.constant 1 : i32
    %71 = tpu.dynamic_rotate %70 by %c1_i32_22 dim 0 : vector<32x128xf32>, i32 -> vector<32x128xf32>
    %c31_i32_23 = arith.constant 31 : i32
    %72 = tpu.dynamic_rotate %70 by %c31_i32_23 dim 0 : vector<32x128xf32>, i32 -> vector<32x128xf32>
    %73 = arith.addf %70, %71 : vector<32x128xf32>
    %74 = arith.addf %73, %72 : vector<32x128xf32>
    %75 = arith.subf %72, %71 : vector<32x128xf32>
    %76 = arith.mulf %75, %28 : vector<32x128xf32>
    %77 = arith.addf %74, %76 : vector<32x128xf32>
    %c1_i32_24 = arith.constant 1 : i32
    %78 = tpu.dynamic_rotate %77 by %c1_i32_24 dim 1 : vector<32x128xf32>, i32 -> vector<32x128xf32>
    %c127_i32_25 = arith.constant 127 : i32
    %79 = tpu.dynamic_rotate %77 by %c127_i32_25 dim 1 : vector<32x128xf32>, i32 -> vector<32x128xf32>
    %80 = arith.addf %77, %78 : vector<32x128xf32>
    %81 = arith.addf %80, %79 : vector<32x128xf32>
    %82 = arith.subf %79, %78 : vector<32x128xf32>
    %83 = arith.mulf %82, %39 : vector<32x128xf32>
    %84 = arith.addf %81, %83 : vector<32x128xf32>
    %85 = arith.mulf %41, %41 : vector<32x128xf32>
    %c1_i32_26 = arith.constant 1 : i32
    %86 = tpu.dynamic_rotate %85 by %c1_i32_26 dim 0 : vector<32x128xf32>, i32 -> vector<32x128xf32>
    %c31_i32_27 = arith.constant 31 : i32
    %87 = tpu.dynamic_rotate %85 by %c31_i32_27 dim 0 : vector<32x128xf32>, i32 -> vector<32x128xf32>
    %88 = arith.addf %85, %86 : vector<32x128xf32>
    %89 = arith.addf %88, %87 : vector<32x128xf32>
    %90 = arith.subf %87, %86 : vector<32x128xf32>
    %91 = arith.mulf %90, %28 : vector<32x128xf32>
    %92 = arith.addf %89, %91 : vector<32x128xf32>
    %c1_i32_28 = arith.constant 1 : i32
    %93 = tpu.dynamic_rotate %92 by %c1_i32_28 dim 1 : vector<32x128xf32>, i32 -> vector<32x128xf32>
    %c127_i32_29 = arith.constant 127 : i32
    %94 = tpu.dynamic_rotate %92 by %c127_i32_29 dim 1 : vector<32x128xf32>, i32 -> vector<32x128xf32>
    %95 = arith.addf %92, %93 : vector<32x128xf32>
    %96 = arith.addf %95, %94 : vector<32x128xf32>
    %97 = arith.subf %94, %93 : vector<32x128xf32>
    %98 = arith.mulf %97, %39 : vector<32x128xf32>
    %99 = arith.addf %96, %98 : vector<32x128xf32>
    %100 = arith.mulf %40, %41 : vector<32x128xf32>
    %c1_i32_30 = arith.constant 1 : i32
    %101 = tpu.dynamic_rotate %100 by %c1_i32_30 dim 0 : vector<32x128xf32>, i32 -> vector<32x128xf32>
    %c31_i32_31 = arith.constant 31 : i32
    %102 = tpu.dynamic_rotate %100 by %c31_i32_31 dim 0 : vector<32x128xf32>, i32 -> vector<32x128xf32>
    %103 = arith.addf %100, %101 : vector<32x128xf32>
    %104 = arith.addf %103, %102 : vector<32x128xf32>
    %105 = arith.subf %102, %101 : vector<32x128xf32>
    %106 = arith.mulf %105, %28 : vector<32x128xf32>
    %107 = arith.addf %104, %106 : vector<32x128xf32>
    %c1_i32_32 = arith.constant 1 : i32
    %108 = tpu.dynamic_rotate %107 by %c1_i32_32 dim 1 : vector<32x128xf32>, i32 -> vector<32x128xf32>
    %c127_i32_33 = arith.constant 127 : i32
    %109 = tpu.dynamic_rotate %107 by %c127_i32_33 dim 1 : vector<32x128xf32>, i32 -> vector<32x128xf32>
    %110 = arith.addf %107, %108 : vector<32x128xf32>
    %111 = arith.addf %110, %109 : vector<32x128xf32>
    %112 = arith.subf %109, %108 : vector<32x128xf32>
    %113 = arith.mulf %112, %39 : vector<32x128xf32>
    %114 = arith.addf %111, %113 : vector<32x128xf32>
    %115 = arith.mulf %55, %69 : vector<32x128xf32>
    %116 = arith.addf %115, %115 : vector<32x128xf32>
    %117 = arith.mulf %55, %55 : vector<32x128xf32>
    %118 = arith.mulf %69, %69 : vector<32x128xf32>
    %119 = arith.addf %117, %118 : vector<32x128xf32>
    %cst_34 = arith.constant 8.100000e-03 : f32
    %120 = vector.broadcast %cst_34 : f32 to vector<32x128xf32>
    %121 = arith.addf %116, %120 : vector<32x128xf32>
    %cst_35 = arith.constant 1.800000e+01 : f32
    %122 = vector.broadcast %cst_35 : f32 to vector<32x128xf32>
    %123 = arith.mulf %122, %114 : vector<32x128xf32>
    %124 = arith.subf %123, %116 : vector<32x128xf32>
    %cst_36 = arith.constant 7.290000e-02 : f32
    %125 = vector.broadcast %cst_36 : f32 to vector<32x128xf32>
    %126 = arith.addf %124, %125 : vector<32x128xf32>
    %127 = arith.mulf %121, %126 : vector<32x128xf32>
    %cst_37 = arith.constant 8.100000e-03 : f32
    %128 = vector.broadcast %cst_37 : f32 to vector<32x128xf32>
    %129 = arith.addf %119, %128 : vector<32x128xf32>
    %130 = arith.addf %84, %99 : vector<32x128xf32>
    %cst_38 = arith.constant 9.000000e+00 : f32
    %131 = vector.broadcast %cst_38 : f32 to vector<32x128xf32>
    %132 = arith.mulf %131, %130 : vector<32x128xf32>
    %133 = arith.subf %132, %119 : vector<32x128xf32>
    %cst_39 = arith.constant 7.290000e-02 : f32
    %134 = vector.broadcast %cst_39 : f32 to vector<32x128xf32>
    %135 = arith.addf %133, %134 : vector<32x128xf32>
    %136 = arith.mulf %129, %135 : vector<32x128xf32>
    %137 = tpu.reciprocal %136 {approx = true} : vector<32x128xf32> -> vector<32x128xf32>
    %138 = arith.mulf %136, %137 : vector<32x128xf32>
    %cst_40 = arith.constant 2.000000e+00 : f32
    %139 = vector.broadcast %cst_40 : f32 to vector<32x128xf32>
    %140 = arith.subf %139, %138 : vector<32x128xf32>
    %141 = arith.mulf %137, %140 : vector<32x128xf32>
    %142 = arith.mulf %127, %141 : vector<32x128xf32>
    %cst_41 = arith.constant 1.000000e+00 : f32
    %143 = vector.broadcast %cst_41 : f32 to vector<32x128xf32>
    %144 = arith.subf %143, %142 : vector<32x128xf32>
    %cst_42 = arith.constant 5.000000e-01 : f32
    %145 = vector.broadcast %cst_42 : f32 to vector<32x128xf32>
    %146 = arith.mulf %144, %145 : vector<32x128xf32>
    %cst_43 = arith.constant 0.000000e+00 : f32
    %cst_44 = arith.constant 1.000000e+00 : f32
    %147 = vector.broadcast %cst_43 : f32 to vector<32x128xf32>
    %148 = arith.maximumf %147, %146 : vector<32x128xf32>
    %149 = vector.broadcast %cst_44 : f32 to vector<32x128xf32>
    %150 = arith.minimumf %149, %148 : vector<32x128xf32>
    %c0_45 = arith.constant 0 : index
    %c0_46 = arith.constant 0 : index
    %151 = vector.load %arg3[%c0_45, %c0_46] : memref<32x128xf32, #tpu.memory_space<vmem>>, vector<32x128xf32>
    tpu.vector_store %arg3[%c0_45, %c0_46], %150 {strides = array<i32>} : memref<32x128xf32, #tpu.memory_space<vmem>>, vector<32x128xf32>,
    return
  }
  func.func @transform_0(%arg0: i32) -> (i32, i32) {
    %c0_i32 = arith.constant 0 : i32
    %c0_i32_0 = arith.constant 0 : i32
    return %arg0, %c0_i32 : i32, i32
  }
  func.func @transform_1(%arg0: i32) -> (i32, i32) {
    %c0_i32 = arith.constant 0 : i32
    %c0_i32_0 = arith.constant 0 : i32
    return %arg0, %c0_i32 : i32, i32
  }
  func.func @transform_2(%arg0: i32) -> (i32, i32) {
    %c0_i32 = arith.constant 0 : i32
    %c0_i32_0 = arith.constant 0 : i32
    return %arg0, %c0_i32 : i32, i32
  }
}

</mosaic_0001>

<bundles_post_ra>
// kernel: tpu_custom_call.1
= control target key start
LH: loop header
LB: loop body
LE: loop exit
PB: predicated region body
PF: predicated region fallthrough
CT: control target
= control target key end

     0   :  { %7 = vsyncpa [#allocation3], 0  ;;  %s1797_s0 = inlined_call_operand.hbm [shape: f32[128,128], index: 0, kind: input, shape index: {}]   ;;  %s1798_s1 = inlined_call_operand.hbm [shape: f32[128,128], index: 1, kind: input, shape index: {}]   ;;  %s1799_s2 = inlined_call_operand.hbm [shape: f32[128,128], index: 2, kind: output, shape index: {}]  }
   0x1   :  { %9 = vsyncpa [#allocation3 + $0x1], 0 }
   0x2   :  { %10 = vsyncpa [#allocation6], 0 }
   0x3   :  { %12 = vsyncpa [#allocation6 + $0x1], 0 }
   0x4   :  { %13 = vsyncpa [#allocation4], 0 }
   0x5   :  { %15 = vsyncpa [#allocation4 + $0x1], 0  ;;  %s1125_s9 = smov 0   ;;  %s1127_s10 = smov 0  }
   0x6   :  { %s1129_s11 = smov 0   ;;  %s1131_s12 = smov 0  }
   0x7 LB: > { %s1146_s13 = sadd.s32 4294967295, %s1098_s12   ;;  %s881_s14 = sadd.s32 4294967294, %s1098_s12   ;;  %s1098_s12 = sphi %s1131_s12, %s1814_s12   ;;  %s1094_s11 = sphi %s1129_s11, %s1813_s11   ;;  %s1090_s10 = sphi %s1127_s10, %s1812_s10   ;;  %s1086_s9 = sphi %s1125_s9, %s1811_s9  }
   0x8   : > { %s1150_s15 = sadd.s32 1, %s1098_s12   ;;  %s28_s16 = sadd.s32 1, %s1094_s11 }
   0x9   : > { %s25_s17 = ssub.s32 %s1098_s12, %s1150_s15  ;;  %p35_p0 = scmp.ne.s32.totalorder %s1094_s11, %s1090_s10 }
   0xa   : > { %p26_p1 = scmp.eq.s32.totalorder %s25_s17, 0  ;;  %p36_p2 = scmp.eq.s32.totalorder %s1098_s12, 0 }
   0xb   : > { %p41_p3 = scmp.ne.s32.totalorder %s1090_s10, %s1086_s9  ;;  %p42_p4 = scmp.eq.s32.totalorder %s1146_s13, 0 }
   0xc   : > { %s1162_s18 = scalar_select %p26_p1, %s1094_s11, %s28_s16  }
   0xd   : > { %p1164_p5 = por %p36_p2, %p35_p0  ;;  %p1168_p6 = por %p42_p4, %p41_p3 }
   0xe   : > { %p91_p7 = scmp.eq.s32.totalorder %s1146_s13, 3  ;;  %p97_p8 = scmp.eq.s32.totalorder %s881_s14, 3 }
   0xf   : > { %s1803_s20 = scalar_select %p1168_p6, 1, 0 }
  0x10   : > { %p919_p9 = scmp.lt.s32.totalorder %s1098_s12, 4  ;;  %p1174_p10 = por %p91_p7, %p35_p0 }
  0x11   : > { %p1178_p11 = por %p97_p8, %p41_p3  ;;  %s1183_s23 = sand.u32 1, %s1094_s11  }
  0x12   : > { %s1804_s21 = scalar_select %p1174_p10, 1, 0 }
  0x13   : > { %s1805_s22 = scalar_select %p1178_p11, 1, 0 }
  0x14   : > { %s899_s24 = sshll.u32 %s1098_s12, 9  ;;  %s884_s25 = sshll.u32 %s1183_s23, 5 }
  0x15   : > { %s1192_s28 = scalar_lea.hbm %s1797_s0, %s899_s24  ;;  %s121_s29 = scalar_lea.vmem [#allocation2], %s884_s25 }
  0x16   : > { %s128_s30 = sshll.u32 %s121_s29, 4  ;;  %p1198_p12 = pnand %p919_p9, %p1164_p5  ;;  %s1202_s30 = int_to_ptr.vmem [resolvable:$true] %s128_s30 }
  0x17   : > { %s118_s4 = scalar_lea.sflag [#allocation3], %s1183_s23  ;;  %s968_s5 = scalar_lea.hbm %s1192_s28, 512 }
  0x18   : > { %p969_p13 = scmp.ne.s32.totalorder %s1192_s28, %s968_s5  ;;  %p970_p0 = pneg %p1198_p12 }
  0x19   : > { %s973_s8 = scalar_lea.hbm %s1797_s0, 2048  ;;  %p974_p3 = scmp.lt.u32.totalorder %s1192_s28, %s1797_s0 }
  0x1a   : > { %p971_p1 = pnand %p970_p0, %p969_p13  ;;  %p975_p4 = scmp.lt.u32.totalorder %s973_s8, %s968_s5 }
  0x1b   : > { %p977_p7 = scmp.lt.u32.totalorder %s968_s5, %s1192_s28 }
  0x1c   : > { %p972_p2 = pneg %p971_p1  ;;  %p976_p5 = por %p975_p4, %p974_p3 }
  0x1e   : > { %p978_p8 = por %p977_p7, %p976_p5 }
  0x20   : > { %p979_p9 = pnand %p978_p8, %p972_p2 }
  0x22   : > { %982 = shalt.err (!%p979_p9)
}
  0x23   : > { %s983_s17 = scalar_lea.vmem %s1202_s30, 512  ;;  %s1100_s19 = smov [#allocation2]  }
  0x24   : > { %p984_p13 = scmp.ne.s32.totalorder %s1202_s30, %s983_s17  ;;  %s988_s26 = sshll.u32 %s1100_s19, 4  ;;  %s989_s26 = int_to_ptr.vmem [resolvable:$false] %s988_s26 }
  0x25   : > { %s990_s27 = scalar_lea.vmem %s989_s26, 1024  ;;  %p991_p10 = scmp.lt.s32.totalorder %s1202_s30, %s989_s26 }
  0x26   : > { %p986_p1 = pnand %p984_p13, %p970_p0  ;;  %p992_p3 = scmp.lt.s32.totalorder %s990_s27, %s983_s17 }
  0x28   : > { %p987_p11 = pneg %p986_p1  ;;  %p993_p4 = por %p992_p3, %p991_p10 }
  0x2a   : > { %p994_p5 = pnand %p993_p4, %p987_p11 }
  0x2c   : > { %997 = shalt.err (!%p994_p5)
}
  0x2d   : > { %s1101_s29 = smov 128   ;;  %s1102_s5 = smov 8  }
  0x2e   : > { %911 = dma.hbm_to_vmem [thread:$0]  (!%p1198_p12), %s1192_s28, 512, %s1202_s30, %s118_s4, %s1101_s29, %s1101_s29, %s1102_s5  }
  0x2f   : > { %p890_p10 = scmp.ge.s32.totalorder %s1098_s12, 1  ;;  %p157_p11 = scmp.lt.s32.totalorder %s1098_s12, 5 }
  0x30   : > { %s1246_s14 = scalar_lea.hbm %s1798_s1, %s899_s24  ;;  %s142_s16 = scalar_lea.vmem [#allocation5], %s884_s25 }
  0x31   : > { %p1237_p2 = pnand %p890_p10, %p157_p11  ;;  %s149_s17 = sshll.u32 %s142_s16, 4  ;;  %s1250_s17 = int_to_ptr.vmem [resolvable:$true] %s149_s17 }
  0x32   : > { %s139_s28 = scalar_lea.sflag [#allocation6], %s1183_s23  ;;  %s998_s30 = scalar_lea.hbm %s1246_s14, 512 }
  0x33   : > { %p999_p7 = scmp.ne.s32.totalorder %s1246_s14, %s998_s30  ;;  %s1003_s24 = scalar_lea.hbm %s1798_s1, 2048 }
  0x34   : > { %p1004_p13 = scmp.lt.u32.totalorder %s1246_s14, %s1798_s1  ;;  %p1005_p1 = scmp.lt.u32.totalorder %s1003_s24, %s998_s30 }
  0x35   : > { %p1001_p8 = pnand %p999_p7, %p970_p0  ;;  %p1007_p4 = scmp.lt.u32.totalorder %s998_s30, %s1246_s14 }
  0x36   : > { %p1006_p3 = por %p1005_p1, %p1004_p13 }
  0x37   : > { %p1002_p9 = pneg %p1001_p8 }
  0x38   : > { %p1008_p5 = por %p1007_p4, %p1006_p3 }
  0x3a   : > { %p1009_p10 = pnand %p1008_p5, %p1002_p9 }
  0x3c   : > { %1012 = shalt.err (!%p1009_p10)
}
  0x3d   : > { %s1013_s25 = scalar_lea.vmem %s1250_s17, 512  ;;  %s1103_s7 = smov [#allocation5]  }
  0x3e   : > { %p1014_p11 = scmp.ne.s32.totalorder %s1250_s17, %s1013_s25  ;;  %s1018_s8 = sshll.u32 %s1103_s7, 4  ;;  %s1019_s8 = int_to_ptr.vmem [resolvable:$false] %s1018_s8 }
  0x3f   : > { %s1020_s16 = scalar_lea.vmem %s1019_s8, 1024  ;;  %p1021_p6 = scmp.lt.s32.totalorder %s1250_s17, %s1019_s8 }
  0x40   : > { %p1016_p7 = pnand %p1014_p11, %p970_p0  ;;  %p1022_p13 = scmp.lt.s32.totalorder %s1020_s16, %s1013_s25 }
  0x42   : > { %p1017_p8 = pneg %p1016_p7  ;;  %p1023_p1 = por %p1022_p13, %p1021_p6 }
  0x44   : > { %p1024_p3 = pnand %p1023_p1, %p1017_p8 }
  0x46   : > { %1027 = shalt.err (!%p1024_p3)
}
  0x47   : > { %914 = dma.hbm_to_vmem [thread:$0]  (!%p1198_p12), %s1246_s14, 512, %s1250_s17, %s139_s28, %s1101_s29, %s1101_s29, %s1102_s5  }
  0x48   : > { %161 = sbr.rel (%p1237_p2) target bundleno = 332 (0x14c), region = 28  ;;  %s1284_s30 = sand.u32 (!%p1237_p2), 1, %s1090_s10  }
  0x49   : > { %s1287_s4 = sshll.u32 (!%p1237_p2), %s1284_s30, 5  ;;  %s164_s3 = scalar_lea.sflag (!%p1237_p2), [#allocation3], %s1284_s30 }
  0x4a   : > { %s1291_s19 = scalar_lea.vmem (!%p1237_p2), [#allocation2], %s1287_s4  ;;  %p1808_p6 = scmp.ne.s32.totalorder (!%p1237_p2), %s1803_s20, 0 }
  0x4f   : > { %1073 = dma.done.wait (%p1808_p6), %s164_s3, 512  }
  0x50   : > { %1075 = vsyncadd (%p1808_p6), %s164_s3, 4294966784  ;;  %s173_s23 = scalar_lea.sflag [#allocation6], %s1284_s30  ;;  %s1299_s29 = scalar_lea.vmem [#allocation5], %s1287_s4 }
  0x51   : > { %1077 = dma.done.wait (%p1808_p6), %s173_s23, 512  }
  0x52   : > { %1079 = vsyncadd (%p1808_p6), %s173_s23, 4294966784  ;;  %v205_v0 = vlaneseq  ;;  %v1104_v4 = vmov 0.0   ;;  %v1314_v10 = vld [vmem:[%s1291_s19 + $0x8] sm:$0xff]  ;;  %v1317_v11 = vld [vmem:[%s1291_s19 + $0x10] sm:$0xff]  ;;  %s1105_s20 = smov 1   ;;  %s1106_s5 = smov 127  }
  0x53   : > { %v1320_v12 = vld [vmem:[%s1291_s19 + $0x18] sm:$0xff]  ;;  %v294_v15 = vrot.slane %v1314_v10, 7  ;;  %v295_v16 = vrot.slane %v1317_v11, 7  ;;  %v304_v17 = vrot.slane %v1317_v11, 1  ;;  %v1328_v18 = vld [vmem:[%s1291_s19] sm:$0xff]  ;;  %v303_v26 = vrot.slane %v1314_v10, 1 }
  0x54   : > { %v1305_v1 = vshrl.u32 %v205_v0, 7  ;;  %v259_v2 = vand.u32 127, %v205_v0  ;;  %v305_v20 = vrot.slane %v1320_v12, 1  ;;  %v293_v22 = vrot.slane %v1328_v18, 7  ;;  %v1359_v46 = vld [vmem:[%s1299_s29] sm:$0xff]  ;;  %v1366_v50 = vld [vmem:[%s1299_s29 + $0x8] sm:$0xff] }
  0x55   : > { %v296_v24 = vrot.slane %v1320_v12, 7  ;;  %v302_v25 = vrot.slane %v1328_v18, 1  ;;  %v1369_v51 = vld [vmem:[%s1299_s29 + $0x10] sm:$0xff]  ;;  %v1377_v56 = vld [vmem:[%s1299_s29 + $0x18] sm:$0xff]  ;;  %v367_v60 = vrot.slane %v1359_v46, 7  ;;  %v368_v62 = vrot.slane %v1366_v50, 7 }
  0x56   : > { %v208_v3 = vadd.s32 16, %v1305_v1  ;;  %vm280_vm0 = vcmp.eq.s32.totalorder %v259_v2, 0  ;;  %vm282_vm1 = vcmp.eq.s32.totalorder %v259_v2, 127  ;;  %v214_v7 = vand.u32 15, %v1305_v1  ;;  %s201_s6 = scalar_lea.vmem [#allocation7], %s1287_s4  ;;  %s901_s14 = sshll.u32 %s1146_s13, 9 }
  0x57   : > { %v281_v5 = vsel %vm280_vm0, 1.0, %v1104_v4  ;;  %v283_v6 = vsel %vm282_vm1, 1.0, %v1104_v4  ;;  %vm297_vm2 = vcmp.lt.s32.totalorder %v1305_v1, 1  ;;  %vm306_vm3 = vcmp.lt.s32.totalorder %v1305_v1, 7  ;;  %s785_s17 = sshll.u32 %s201_s6, 4  ;;  %s1752_s26 = scalar_lea.hbm %s1799_s2, %s901_s14  ;;  %s1754_s17 = int_to_ptr.vmem [resolvable:$true] %s785_s17 }
  0x58   : > { %v228_v8 = vand.u32 15, %v208_v3  ;;  %v1309_v9 = vsub.f32 %v281_v5, %v283_v6  ;;  %vm260_vm4 = vcmp.eq.s32.totalorder %v214_v7, 0  ;;  %v209_v13 = vadd.s32 24, %v1305_v1  ;;  %s772_s27 = scalar_lea.sflag [#allocation4], %s1284_s30  ;;  %s1028_s25 = scalar_lea.vmem %s1754_s17, 512 }
  0x59   : > { %v207_v14 = vadd.s32 8, %v1305_v1  ;;  %v1333_v21 = vsel %vm260_vm4, 1.0, %v1104_v4  ;;  %v299_v23 = vsel %vm297_vm2, %v294_v15, %v295_v16  ;;  %v307_v27 = vsel %vm306_vm3, %v304_v17, %v305_v20  ;;  %p1029_p12 = scmp.ne.s32.totalorder %s1754_s17, %s1028_s25  ;;  %p1809_p0 = scmp.ne.s32.totalorder %s1804_s21, 0 }
  0x5a   : > { %vm262_vm5 = vcmp.eq.s32.totalorder %v228_v8, 0  ;;  %v313_v28 = vadd.f32 %v299_v23, %v1317_v11  ;;  %v235_v29 = vand.u32 15, %v209_v13  ;;  %v321_v31 = vsub.f32 %v307_v27, %v299_v23  ;;  %s1107_s13 = smov [#allocation7]  }
  0x5b   : > { %v1330_v19 = vsel %vm262_vm5, 1.0, %v1104_v4  ;;  %v221_v30 = vand.u32 15, %v207_v14  ;;  %v301_v32 = vsel %vm297_vm2, %v296_v24, %v293_v22  ;;  %v309_v33 = vsel %vm306_vm3, %v302_v25, %v303_v26  ;;  %p1030_p2 = pnand %p1029_p12, %p1809_p0  ;;  %s1032_s7 = sshll.u32 %s1107_s13, 4  ;;  %s1033_s7 = int_to_ptr.vmem [resolvable:$false] %s1032_s7 }
  0x5c   : > { %v298_v34 = vsel %vm297_vm2, %v295_v16, %v296_v24  ;;  %v317_v35 = vadd.f32 %v313_v28, %v307_v27  ;;  %v311_v36 = vadd.f32 %v301_v32, %v1328_v18  ;;  %v319_v37 = vsub.f32 %v309_v33, %v301_v32  ;;  %s1034_s8 = scalar_lea.vmem %s1033_s7, 1024  ;;  %p1035_p4 = scmp.lt.s32.totalorder %s1754_s17, %s1033_s7 }
  0x5d   : > { %vm271_vm6 = vcmp.eq.s32.totalorder %v235_v29, 15  ;;  %v325_v38 = vmul.f32 %v321_v31, %v1330_v19  ;;  %v310_v40 = vsel %vm306_vm3, %v305_v20, %v302_v25  ;;  %v314_v41 = vadd.f32 %v298_v34, %v1320_v12  ;;  %p1031_p9 = pneg %p1030_p2  ;;  %p1036_p5 = scmp.lt.s32.totalorder %s1034_s8, %s1028_s25 }
  0x5e   : > { %v275_v39 = vsel %vm271_vm6, 1.0, %v1104_v4  ;;  %v315_v42 = vadd.f32 %v311_v36, %v309_v33  ;;  %v323_v43 = vmul.f32 %v319_v37, %v1333_v21  ;;  %v322_v45 = vsub.f32 %v310_v40, %v298_v34 }
  0x5f   : > { %v1356_v44 = vsub.f32 0.0, %v275_v39  ;;  %v1361_v47 = vadd.f32 %v325_v38, %v317_v35  ;;  %v318_v48 = vadd.f32 %v314_v41, %v310_v40  ;;  %vm269_vm7 = vcmp.eq.s32.totalorder %v221_v30, 15  ;;  %p1037_p10 = por %p1036_p5, %p1035_p4 }
  0x60   : > { %v300_v49 = vsel %vm297_vm2, %v293_v22, %v294_v15  ;;  %v1371_v52 = vadd.f32 %v323_v43, %v315_v42  ;;  %v273_v54 = vsel %vm269_vm7, 1.0, %v1104_v4  ;;  %v308_v55 = vsel %vm306_vm3, %v303_v26, %v304_v17 }
  0x61   : > { %v326_v53 = vmul.f32 %v322_v45, %v1356_v44  ;;  %335 = vrot.lane.b32.xlu1 %v1361_v47, %s1105_s20  ;;  %v1381_v57 = vsub.f32 0.0, %v273_v54  ;;  %v312_v58 = vadd.f32 %v300_v49, %v1314_v10  ;;  %v320_v59 = vsub.f32 %v308_v55, %v300_v49  ;;  %p1038_p11 = pnand %p1037_p10, %p1031_p9 }
  0x62   : > { %331 = vrot.lane.b32.xlu0 %v1371_v52, %s1105_s20  ;;  %v376_v63 = vrot.slane %v1366_v50, 1  ;;  %v377_v0 = vrot.slane %v1369_v51, 1  ;;  %v370_v4 = vrot.slane %v1377_v56, 7  ;;  %v375_v5 = vrot.slane %v1359_v46, 1 }
  0x63   : > { %v1387_v61 = vadd.f32 %v326_v53, %v318_v48  ;;  %v316_v2 = vadd.f32 %v312_v58, %v308_v55  ;;  %v324_v3 = vmul.f32 %v320_v59, %v1381_v57  ;;  %v373_v6 = vsel %vm297_vm2, %v367_v60, %v368_v62 }
  0x64   : > { %v380_v7 = vsel %vm306_vm3, %v376_v63, %v377_v0  ;;  %v369_v8 = vrot.slane %v1369_v51, 7  ;;  %v378_v13 = vrot.slane %v1377_v56, 1  ;;  %v384_v15 = vadd.f32 %v373_v6, %v1366_v50 }
  0x65   : > { %337 = vrot.lane.b32.xlu1 %v1387_v61, %s1105_s20  ;;  %v1403_v14 = vadd.f32 %v324_v3, %v316_v2  ;;  %v392_v16 = vsub.f32 %v380_v7, %v373_v6  ;;  %v374_v17 = vsel %vm297_vm2, %v370_v4, %v367_v60  ;;  %v381_v20 = vsel %vm306_vm3, %v375_v5, %v376_v63 }
  0x66   : > { %v383_v22 = vadd.f32 %v374_v17, %v1359_v46  ;;  %v371_v23 = vsel %vm297_vm2, %v369_v8, %v370_v4  ;;  %v382_v24 = vsel %vm306_vm3, %v378_v13, %v375_v5  ;;  %v388_v25 = vadd.f32 %v384_v15, %v380_v7 }
  0x67   : > { %333 = vrot.lane.b32.xlu0 %v1403_v14, %s1105_s20  ;;  %v396_v26 = vmul.f32 %v392_v16, %v1381_v57  ;;  %v391_v27 = vsub.f32 %v381_v20, %v374_v17  ;;  %v386_v28 = vadd.f32 %v371_v23, %v1377_v56  ;;  %v394_v29 = vsub.f32 %v382_v24, %v371_v23 }
  0x68   : > { %v372_v30 = vsel %vm297_vm2, %v368_v62, %v369_v8  ;;  %v379_v31 = vsel %vm306_vm3, %v377_v0, %v378_v13  ;;  %v387_v32 = vadd.f32 %v383_v22, %v381_v20  ;;  %v439_v35 = vmul.f32 %v1328_v18, %v1328_v18 }
  0x69   : > { %341 = vrot.lane.b32.xlu1 %v1403_v14, %s1106_s5  ;;  %v385_v33 = vadd.f32 %v372_v30, %v1369_v51  ;;  %v393_v34 = vsub.f32 %v379_v31, %v372_v30  ;;  %v440_v36 = vmul.f32 %v1314_v10, %v1314_v10  ;;  %v1432_v37 = vadd.f32 %v396_v26, %v388_v25 }
  0x6a   : > { %v395_v38 = vmul.f32 %v391_v27, %v1333_v21  ;;  %v441_v39 = vmul.f32 %v1317_v11, %v1317_v11  ;;  %v442_v40 = vmul.f32 %v1320_v12, %v1320_v12  ;;  %v390_v41 = vadd.f32 %v386_v28, %v382_v24 }
  0x6b   : > { %339 = vrot.lane.b32.xlu0 %v1371_v52, %s1106_s5  ;;  %v398_v42 = vmul.f32 %v394_v29, %v1356_v44  ;;  %v443_v43 = vrot.slane %v439_v35, 7  ;;  %v444_v45 = vrot.slane %v440_v36, 7  ;;  %v452_v48 = vrot.slane %v440_v36, 1 }
  0x6c   : > { %v453_v49 = vrot.slane %v441_v39, 1  ;;  %v446_v53 = vrot.slane %v442_v40, 7  ;;  %v451_v54 = vrot.slane %v439_v35, 1  ;;  %v389_v55 = vadd.f32 %v385_v33, %v379_v31 }
  0x6d   : > { %345 = vrot.lane.b32.xlu1 %v1387_v61, %s1106_s5  ;;  %v397_v58 = vmul.f32 %v393_v34, %v1330_v19  ;;  %v445_v59 = vrot.slane %v441_v39, 7  ;;  %v454_v60 = vrot.slane %v442_v40, 1  ;;  %v1445_v62 = vadd.f32 %v395_v38, %v387_v32 }
  0x6e   : > { %v449_v63 = vsel %vm297_vm2, %v443_v43, %v444_v45  ;;  %v456_v0 = vsel %vm306_vm3, %v452_v48, %v453_v49  ;;  %v450_v2 = vsel %vm297_vm2, %v446_v53, %v443_v43  ;;  %v457_v3 = vsel %vm306_vm3, %v451_v54, %v452_v48 }
  0x6f   : > { %343 = vrot.lane.b32.xlu0 %v1361_v47, %s1106_s5  ;;  %v1457_v4 = vadd.f32 %v398_v42, %v390_v41  ;;  %v447_v5 = vsel %vm297_vm2, %v445_v59, %v446_v53  ;;  %v458_v6 = vsel %vm306_vm3, %v454_v60, %v451_v54  ;;  %v1463_v7 = vadd.f32 %v397_v58, %v389_v55 }
  0x70   : > { %v460_v8 = vadd.f32 %v449_v63, %v440_v36  ;;  %v468_v13 = vsub.f32 %v456_v0, %v449_v63  ;;  %v448_v15 = vsel %vm297_vm2, %v444_v45, %v445_v59  ;;  %v459_v16 = vadd.f32 %v450_v2, %v439_v35 }
  0x71   : > { %405 = vrot.lane.b32.xlu1 %v1432_v37, %s1105_s20  ;;  %v467_v17 = vsub.f32 %v457_v3, %v450_v2  ;;  %v455_v20 = vsel %vm306_vm3, %v453_v49, %v454_v60  ;;  %v515_v22 = vmul.f32 %v1359_v46, %v1359_v46  ;;  %v462_v23 = vadd.f32 %v447_v5, %v442_v40 }
  0x72   : > { %v470_v24 = vsub.f32 %v458_v6, %v447_v5  ;;  %v461_v25 = vadd.f32 %v448_v15, %v441_v39  ;;  %v469_v26 = vsub.f32 %v455_v20, %v448_v15  ;;  %v516_v27 = vmul.f32 %v1366_v50, %v1366_v50 }
  0x73   : > { %403 = vrot.lane.b32.xlu0 %v1445_v62, %s1105_s20  ;;  %v1479_v28 = vmul.f32 %v1369_v51, %v1369_v51  ;;  %v464_v29 = vadd.f32 %v460_v8, %v456_v0  ;;  %v472_v30 = vmul.f32 %v468_v13, %v1381_v57  ;;  %v1484_v31 = vmul.f32 %v1377_v56, %v1377_v56 }
  0x74   : > { %v463_v32 = vadd.f32 %v459_v16, %v457_v3  ;;  %v471_v33 = vmul.f32 %v467_v17, %v1333_v21  ;;  %v519_v34 = vrot.slane %v515_v22, 7  ;;  %v520_v35 = vrot.slane %v516_v27, 7 }
  0x75   : > { %409 = vrot.lane.b32.xlu1 %v1457_v4, %s1105_s20  ;;  %v466_v36 = vadd.f32 %v462_v23, %v458_v6  ;;  %v474_v38 = vmul.f32 %v470_v24, %v1356_v44  ;;  %v528_v39 = vrot.slane %v516_v27, 1  ;;  %v529_v40 = vrot.slane %v1479_v28, 1 }
  0x76   : > { %v465_v41 = vadd.f32 %v461_v25, %v455_v20  ;;  %v473_v42 = vmul.f32 %v469_v26, %v1330_v19  ;;  %v522_v43 = vrot.slane %v1484_v31, 7  ;;  %v527_v45 = vrot.slane %v515_v22, 1 }
  0x77   : > { %407 = vrot.lane.b32.xlu0 %v1463_v7, %s1105_s20  ;;  %v521_v48 = vrot.slane %v1479_v28, 7  ;;  %v525_v49 = vsel %vm297_vm2, %v519_v34, %v520_v35  ;;  %v591_v53 = vmul.f32 %v1359_v46, %v1328_v18  ;;  %v1502_v54 = vadd.f32 %v472_v30, %v464_v29 }
  0x78   : > { %v1504_v55 = vadd.f32 %v471_v33, %v463_v32  ;;  %v532_v58 = vsel %vm306_vm3, %v528_v39, %v529_v40  ;;  %v1510_v59 = vadd.f32 %v474_v38, %v466_v36  ;;  %v1512_v60 = vadd.f32 %v473_v42, %v465_v41 }
  0x79   : > { %413 = vrot.lane.b32.xlu1 %v1432_v37, %s1106_s5  ;;  %v526_v63 = vsel %vm297_vm2, %v522_v43, %v519_v34  ;;  %v533_v18 = vsel %vm306_vm3, %v527_v45, %v528_v39  ;;  %v536_v46 = vadd.f32 %v525_v49, %v516_v27  ;;  %v530_v0 = vrot.slane %v1484_v31, 1 }
  0x7a   : > { %v1521_v2 = vsel %vm297_vm2, %v520_v35, %v521_v48  ;;  %v592_v3 = vmul.f32 %v1366_v50, %v1314_v10  ;;  %v544_v5 = vsub.f32 %v532_v58, %v525_v49  ;;  %v523_v6 = vsel %vm297_vm2, %v521_v48, %v522_v43 }
  0x7b   : > { %411 = vrot.lane.b32.xlu0 %v1445_v62, %s1106_s5  ;;  %v593_v8 = vmul.f32 %v1369_v51, %v1317_v11  ;;  %v595_v13 = vrot.slane %v591_v53, 7  ;;  %v535_v15 = vadd.f32 %v526_v63, %v515_v22  ;;  %v543_v16 = vsub.f32 %v533_v18, %v526_v63 }
  0x7c   : > { %v596_v17 = vrot.slane %v592_v3, 7  ;;  %v604_v20 = vrot.slane %v592_v3, 1  ;;  %v594_v10 = vmul.f32 %v1377_v56, %v1320_v12  ;;  %v603_v50 = vrot.slane %v591_v53, 1 }
  0x7d   : > { %417 = vrot.lane.b32.xlu1 %v1457_v4, %s1106_s5  ;;  %v605_v23 = vrot.slane %v593_v8, 1  ;;  %v597_v24 = vrot.slane %v593_v8, 7  ;;  %v540_v25 = vadd.f32 %v536_v46, %v532_v58  ;;  %v534_v26 = vsel %vm306_vm3, %v530_v0, %v527_v45 }
  0x7e   : > { %v538_v11 = vadd.f32 %v523_v6, %v1484_v31  ;;  %v601_v51 = vsel %vm297_vm2, %v595_v13, %v596_v17  ;;  %v598_v29 = vrot.slane %v594_v10, 7  ;;  %v609_v12 = vsel %vm306_vm3, %v603_v50, %v604_v20 }
  0x7f   : > { %415 = vrot.lane.b32.xlu0 %v1463_v7, %s1106_s5  ;;  %v608_v22 = vsel %vm306_vm3, %v604_v20, %v605_v23  ;;  %v612_v27 = vadd.f32 %v601_v51, %v592_v3  ;;  %v548_v56 = vmul.f32 %v544_v5, %v1381_v57  ;;  %v606_v32 = vrot.slane %v594_v10, 1 }
  0x80   : > { %v620_v30 = vsub.f32 %v608_v22, %v601_v51  ;;  %v600_v31 = vsel %vm297_vm2, %v596_v17, %v597_v24  ;;  %v602_v34 = vsel %vm297_vm2, %v598_v29, %v595_v13  ;;  %v599_v35 = vsel %vm297_vm2, %v597_v24, %v598_v29 }
  0x81   : > { %481 = vrot.lane.b32.xlu1 %v1502_v54, %s1105_s20  ;;  %v616_v33 = vadd.f32 %v612_v27, %v608_v22  ;;  %v613_v36 = vadd.f32 %v600_v31, %v593_v8  ;;  %v611_v39 = vadd.f32 %v602_v34, %v591_v53  ;;  %v619_v41 = vsub.f32 %v609_v12, %v602_v34 }
  0x82   : > { %v624_v38 = vmul.f32 %v620_v30, %v1381_v57  ;;  %v610_v42 = vsel %vm306_vm3, %v606_v32, %v603_v50  ;;  %v531_v43 = vsel %vm306_vm3, %v529_v40, %v530_v0  ;;  %v614_v45 = vadd.f32 %v599_v35, %v594_v10 }
  0x83   : > { %479 = vrot.lane.b32.xlu0 %v1504_v55, %s1105_s20  ;;  %v622_v48 = vsub.f32 %v610_v42, %v599_v35  ;;  %v607_v49 = vsel %vm306_vm3, %v605_v23, %v606_v32  ;;  %v615_v63 = vadd.f32 %v611_v39, %v609_v12  ;;  %v623_v57 = vmul.f32 %v619_v41, %v1333_v21 }
  0x84   : > { %v1564_v58 = vadd.f32 %v624_v38, %v616_v33  ;;  %v617_v53 = vadd.f32 %v613_v36, %v607_v49  ;;  %v546_v46 = vsub.f32 %v534_v26, %v523_v6  ;;  %v618_v3 = vadd.f32 %v614_v45, %v610_v42 }
  0x85   : > { %485 = vrot.lane.b32.xlu1 %v1510_v59, %s1105_s20  ;;  %v626_v5 = vmul.f32 %v622_v48, %v1356_v44  ;;  %v621_v8 = vsub.f32 %v607_v49, %v600_v31  ;;  %v539_v40 = vadd.f32 %v535_v15, %v533_v18  ;;  %v547_v0 = vmul.f32 %v543_v16, %v1333_v21 }
  0x86   : > { %v1571_v13 = vadd.f32 %v623_v57, %v615_v63  ;;  %v537_v1 = vadd.f32 %v1521_v2, %v1479_v28  ;;  %v545_v17 = vsub.f32 %v531_v43, %v1521_v2  ;;  %v1583_v18 = vadd.f32 %v548_v56, %v540_v25 }
  0x87   : > { %483 = vrot.lane.b32.xlu0 %v1512_v60, %s1105_s20  ;;  %v1578_v20 = vadd.f32 %v626_v5, %v618_v3  ;;  %v625_v6 = vmul.f32 %v621_v8, %v1330_v19  ;;  %v542_v21 = vadd.f32 %v538_v11, %v534_v26  ;;  %v550_v15 = vmul.f32 %v546_v46, %v1356_v44 }
  0x88   : > { %v1590_v28 = vadd.f32 %v547_v0, %v539_v40  ;;  %v541_v2 = vadd.f32 %v537_v1, %v531_v43  ;;  %v549_v23 = vmul.f32 %v545_v17, %v1330_v19 }
  0x89   : > { %489 = vrot.lane.b32.xlu1 %v1502_v54, %s1106_s5  ;;  %v1586_v16 = vadd.f32 %v625_v6, %v617_v53  ;;  %v1595_v10 = vadd.f32 %v550_v15, %v542_v21 }
  0x8a   : > { %v1599_v50 = vadd.f32 %v549_v23, %v541_v2 }
  0x8b   : > { %487 = vrot.lane.b32.xlu0 %v1504_v55, %s1106_s5 }
  0x8d   : > { %493 = vrot.lane.b32.xlu1 %v1510_v59, %s1106_s5 }
  0x8f   : > { %491 = vrot.lane.b32.xlu0 %v1512_v60, %s1106_s5 }
  0x91   : > { %557 = vrot.lane.b32.xlu1 %v1583_v18, %s1105_s20 }
  0x93   : > { %555 = vrot.lane.b32.xlu0 %v1590_v28, %s1105_s20 }
  0x95   : > { %561 = vrot.lane.b32.xlu1 %v1595_v10, %s1105_s20 }
  0x97   : > { %559 = vrot.lane.b32.xlu0 %v1599_v50, %s1105_s20 }
  0x99   : > { %565 = vrot.lane.b32.xlu1 %v1583_v18, %s1106_s5 }
  0x9b   : > { %563 = vrot.lane.b32.xlu0 %v1590_v28, %s1106_s5 }
  0x9d   : > { %569 = vrot.lane.b32.xlu1 %v1595_v10, %s1106_s5 }
  0x9f   : > { %567 = vrot.lane.b32.xlu0 %v1599_v50, %s1106_s5 }
  0xa1   : > { %633 = vrot.lane.b32.xlu1 %v1564_v58, %s1105_s20 }
  0xa3   : > { %631 = vrot.lane.b32.xlu0 %v1571_v13, %s1105_s20 }
  0xa5   : > { %637 = vrot.lane.b32.xlu1 %v1578_v20, %s1105_s20 }
  0xa7   : > { %635 = vrot.lane.b32.xlu0 %v1586_v16, %s1105_s20 }
  0xa9   : > { %641 = vrot.lane.b32.xlu1 %v1564_v58, %s1106_s5 }
  0xab   : > { %639 = vrot.lane.b32.xlu0 %v1571_v13, %s1106_s5 }
  0xad   : > { %645 = vrot.lane.b32.xlu1 %v1578_v20, %s1106_s5 }
  0xaf   : > { %643 = vrot.lane.b32.xlu0 %v1586_v16, %s1106_s5 }
  0xd3   : > { %v336_v19 = vpop.permute.xlu1 %335 }
  0xd4   : > { %v332_v44 = vpop.permute.xlu0 %331  ;;  %v349_v8 = vadd.f32 %v336_v19, %v1361_v47 }
  0xd5   : > { %v347_v40 = vadd.f32 %v332_v44, %v1371_v52 }
  0xd7   : > { %v338_v24 = vpop.permute.xlu1 %337 }
  0xd8   : > { %v350_v0 = vadd.f32 %v338_v24, %v1387_v61 }
  0xd9   : > { %v334_v25 = vpop.permute.xlu0 %333 }
  0xda   : > { %v348_v46 = vadd.f32 %v334_v25, %v1403_v14 }
  0xdb   : > { %v342_v26 = vpop.permute.xlu1 %341 }
  0xdc   : > { %v356_v41 = vsub.f32 %v342_v26, %v334_v25  ;;  %v352_v17 = vadd.f32 %v348_v46, %v342_v26 }
  0xdd   : > { %v340_v11 = vpop.permute.xlu0 %339 }
  0xde   : > { %v355_v43 = vsub.f32 %v340_v11, %v332_v44  ;;  %v360_v3 = vmul.f32 %v356_v41, %v1309_v9  ;;  %v351_v52 = vadd.f32 %v347_v40, %v340_v11 }
  0xdf   : > { %v346_v51 = vpop.permute.xlu1 %345 }
  0xe0   : > { %v358_v45 = vsub.f32 %v346_v51, %v338_v24  ;;  %v359_v6 = vmul.f32 %v355_v43, %v1309_v9  ;;  %v1657_v23 = vadd.f32 %v360_v3, %v352_v17  ;;  %v354_v61 = vadd.f32 %v350_v0, %v346_v51 }
  0xe1   : > { %v344_v22 = vpop.permute.xlu0 %343 }
  0xe2   : > { %v357_v48 = vsub.f32 %v344_v22, %v336_v19  ;;  %v353_v19 = vadd.f32 %v349_v8, %v344_v22  ;;  %v1659_v26 = vadd.f32 %v359_v6, %v351_v52  ;;  %v676_v11 = vmul.f32 %v1657_v23, %v1657_v23 }
  0xe3   : > { %v406_v27 = vpop.permute.xlu1 %405 }
  0xe4   : > { %v420_v63 = vadd.f32 %v406_v27, %v1432_v37  ;;  %v362_v37 = vmul.f32 %v358_v45, %v1309_v9  ;;  %v361_v21 = vmul.f32 %v357_v48, %v1309_v9  ;;  %v675_v48 = vmul.f32 %v1659_v26, %v1659_v26 }
  0xe5   : > { %v404_v29 = vpop.permute.xlu0 %403 }
  0xe6   : > { %v419_v14 = vadd.f32 %v404_v29, %v1445_v62 }
  0xe7   : > { %v410_v12 = vpop.permute.xlu1 %409 }
  0xe9   : > { %v1629_v56 = vpop.permute.xlu0 %407 }
  0xea   : > { %v421_v41 = vadd.f32 %v1629_v56, %v1463_v7 }
  0xeb   : > { %v414_v30 = vpop.permute.xlu1 %413 }
  0xec   : > { %v428_v39 = vsub.f32 %v414_v30, %v406_v27  ;;  %v424_v1 = vadd.f32 %v420_v63, %v414_v30  ;;  %v1661_v27 = vadd.f32 %v362_v37, %v354_v61  ;;  %v1663_v30 = vadd.f32 %v361_v21, %v353_v19 }
  0xed   : > { %v412_v32 = vpop.permute.xlu0 %411 }
  0xee   : > { %v432_v57 = vmul.f32 %v428_v39, %v1309_v9  ;;  %v427_v53 = vsub.f32 %v412_v32, %v404_v29  ;;  %v423_v24 = vadd.f32 %v419_v14, %v412_v32  ;;  %v422_v32 = vadd.f32 %v410_v12, %v1457_v4 }
  0xef   : > { %v418_v31 = vpop.permute.xlu1 %417  ;;  %v1681_v63 = vmul.f32 %v1661_v27, %v1661_v27 }
  0xf0   : > { %v1654_v2 = vadd.f32 %v432_v57, %v424_v1  ;;  %v431_v47 = vmul.f32 %v427_v53, %v1309_v9  ;;  %v430_v25 = vsub.f32 %v418_v31, %v410_v12  ;;  %v1685_v57 = vmul.f32 %v1663_v30, %v1663_v30 }
  0xf1   : > { %v1631_v33 = vpop.permute.xlu0 %415 }
  0xf2   : > { %v680_v62 = vmul.f32 %v1654_v2, %v1654_v2  ;;  %v1667_v29 = vadd.f32 %v431_v47, %v423_v24  ;;  %v434_v43 = vmul.f32 %v430_v25, %v1309_v9  ;;  %v429_v45 = vsub.f32 %v1631_v33, %v1629_v56 }
  0xf3   : > { %v482_v34 = vpop.permute.xlu1 %481  ;;  %v426_v56 = vadd.f32 %v422_v32, %v418_v31  ;;  %v425_v46 = vadd.f32 %v421_v41, %v1631_v33 }
  0xf4   : > { %v1688_v7 = vadd.f32 %v680_v62, %v676_v11  ;;  %v679_v53 = vmul.f32 %v1667_v29, %v1667_v29  ;;  %v496_v3 = vadd.f32 %v482_v34, %v1502_v54  ;;  %v433_v6 = vmul.f32 %v429_v45, %v1309_v9 }
  0xf5   : > { %v1633_v35 = vpop.permute.xlu0 %479  ;;  %v1699_v17 = vadd.f32 %v434_v43, %v426_v56 }
  0xf6   : > { %v495_v8 = vadd.f32 %v1633_v35, %v1504_v55  ;;  %v1715_v25 = vadd.f32 %v433_v6, %v425_v46 }
  0xf7   : > { %v1635_v36 = vpop.permute.xlu1 %485 }
  0xf8   : > { %v498_v33 = vadd.f32 %v1635_v36, %v1510_v59 }
  0xf9   : > { %v1637_v38 = vpop.permute.xlu0 %483 }
  0xfa   : > { %v497_v43 = vadd.f32 %v1637_v38, %v1512_v60  ;;  %v683_v60 = vadd.f32 %v679_v53, %v675_v48 }
  0xfb   : > { %v490_v42 = vpop.permute.xlu1 %489 }
  0xfc   : > { %v504_v51 = vsub.f32 %v490_v42, %v482_v34  ;;  %v500_v54 = vadd.f32 %v496_v3, %v490_v42 }
  0xfd   : > { %v488_v49 = vpop.permute.xlu0 %487 }
  0xfe   : > { %v503_v4 = vsub.f32 %v488_v49, %v1633_v35  ;;  %v508_v40 = vmul.f32 %v504_v51, %v1309_v9  ;;  %v499_v34 = vadd.f32 %v495_v8, %v488_v49 }
  0xff   : > { %v1643_v5 = vpop.permute.xlu1 %493 }
 0x100   : > { %v506_v0 = vsub.f32 %v1643_v5, %v1635_v36  ;;  %v507_v55 = vmul.f32 %v503_v4, %v1309_v9  ;;  %v512_v61 = vadd.f32 %v508_v40, %v500_v54  ;;  %v502_v62 = vadd.f32 %v498_v33, %v1643_v5 }
 0x101   : > { %v1651_v15 = vpop.permute.xlu0 %491  ;;  %v681_v5 = vmul.f32 %v1715_v25, %v1715_v25  ;;  %v708_v33 = vadd.f32 0.0081, %v1688_v7 }
 0x102   : > { %v510_v19 = vmul.f32 %v506_v0, %v1309_v9  ;;  %v501_v0 = vadd.f32 %v497_v43, %v1651_v15 }
 0x103   : > { %v558_v44 = vpop.permute.xlu1 %557 }
 0x104   : > { %v572_v37 = vadd.f32 %v558_v44, %v1583_v18  ;;  %v505_v18 = vsub.f32 %v1651_v15, %v1637_v38  ;;  %v514_v46 = vadd.f32 %v510_v19, %v502_v62 }
 0x105   : > { %v556_v39 = vpop.permute.xlu0 %555 }
 0x106   : > { %v571_v21 = vadd.f32 %v556_v39, %v1590_v28  ;;  %v682_v28 = vmul.f32 %v1699_v17, %v1699_v17  ;;  %v509_v45 = vmul.f32 %v505_v18, %v1309_v9 }
 0x107   : > { %v562_v22 = vpop.permute.xlu1 %561 }
 0x108   : > { %v513_v54 = vadd.f32 %v509_v45, %v501_v0 }
 0x109   : > { %v560_v12 = vpop.permute.xlu0 %559 }
 0x10b   : > { %v566_v1 = vpop.permute.xlu1 %565 }
 0x10c   : > { %v580_v31 = vsub.f32 %v566_v1, %v558_v44  ;;  %v576_v14 = vadd.f32 %v572_v37, %v566_v1  ;;  %v574_v44 = vadd.f32 %v562_v22, %v1595_v10 }
 0x10d   : > { %v564_v35 = vpop.permute.xlu0 %563 }
 0x10e   : > { %v584_v47 = vmul.f32 %v580_v31, %v1309_v9  ;;  %v579_v52 = vsub.f32 %v564_v35, %v556_v39  ;;  %v575_v42 = vadd.f32 %v571_v21, %v564_v35  ;;  %v511_v39 = vadd.f32 %v507_v55, %v499_v34 }
 0x10f   : > { %v570_v59 = vpop.permute.xlu1 %569  ;;  %v686_v35 = vadd.f32 %v682_v28, %v1681_v63 }
 0x110   : > { %v588_v36 = vadd.f32 %v584_v47, %v576_v14  ;;  %v583_v49 = vmul.f32 %v579_v52, %v1309_v9  ;;  %v582_v24 = vsub.f32 %v570_v59, %v562_v22  ;;  %v578_v41 = vadd.f32 %v574_v44, %v570_v59 }
 0x111   : > { %v568_v11 = vpop.permute.xlu0 %567  ;;  %v573_v22 = vadd.f32 %v560_v12, %v1599_v50  ;;  %v685_v47 = vadd.f32 %v681_v5, %v1685_v57  ;;  %v707_v52 = vadd.f32 0.0081, %v683_v60  ;;  %v710_v59 = vadd.f32 0.0081, %v686_v35 }
 0x112   : > { %v712_v51 = vadd.f32 %v588_v36, %v512_v61  ;;  %v587_v32 = vadd.f32 %v583_v49, %v575_v42  ;;  %v586_v10 = vmul.f32 %v582_v24, %v1309_v9  ;;  %v581_v4 = vsub.f32 %v568_v11, %v560_v12 }
 0x113   : > { %v634_v56 = vpop.permute.xlu1 %633  ;;  %v577_v1 = vadd.f32 %v573_v22, %v568_v11  ;;  %v668_v12 = vmul.f32 %v1654_v2, %v1657_v23  ;;  %v667_v2 = vmul.f32 %v1667_v29, %v1659_v26  ;;  %v709_v42 = vadd.f32 0.0081, %v685_v47 }
 0x114   : > { %v716_v3 = vmul.f32 9.0, %v712_v51  ;;  %v711_v8 = vadd.f32 %v587_v32, %v511_v39  ;;  %v590_v40 = vadd.f32 %v586_v10, %v578_v41  ;;  %v585_v6 = vmul.f32 %v581_v4, %v1309_v9 }
 0x115   : > { %v632_v37 = vpop.permute.xlu0 %631  ;;  %v672_v44 = vadd.f32 %v668_v12, %v668_v12  ;;  %v648_v57 = vadd.f32 %v634_v56, %v1564_v58  ;;  %v670_v58 = vmul.f32 %v1699_v17, %v1661_v27  ;;  %v669_v5 = vmul.f32 %v1715_v25, %v1663_v30 }
 0x116   : > { %v720_v38 = vsub.f32 %v716_v3, %v1688_v7  ;;  %v715_v31 = vmul.f32 9.0, %v711_v8  ;;  %v714_v50 = vadd.f32 %v590_v40, %v514_v46  ;;  %v589_v34 = vadd.f32 %v585_v6, %v577_v1 }
 0x117   : > { %v638_v55 = vpop.permute.xlu1 %637  ;;  %v647_v62 = vadd.f32 %v632_v37, %v1571_v13  ;;  %v671_v40 = vadd.f32 %v667_v2, %v667_v2 }
 0x118   : > { %v724_v15 = vadd.f32 0.0729, %v720_v38  ;;  %v719_v21 = vsub.f32 %v715_v31, %v683_v60  ;;  %v718_v14 = vmul.f32 9.0, %v714_v50  ;;  %v713_v48 = vadd.f32 %v589_v34, %v513_v54 }
 0x119   : > { %v636_v53 = vpop.permute.xlu0 %635  ;;  %v650_v26 = vadd.f32 %v638_v55, %v1578_v20  ;;  %v674_v60 = vadd.f32 %v670_v58, %v670_v58  ;;  %v688_v34 = vadd.f32 0.0081, %v672_v44 }
 0x11a   : > { %v728_v61 = vmul.f32 %v724_v15, %v708_v33  ;;  %v723_v19 = vadd.f32 0.0729, %v719_v21  ;;  %v722_v18 = vsub.f32 %v718_v14, %v686_v35  ;;  %v717_v23 = vmul.f32 9.0, %v713_v48 }
 0x11b   : > { %v642_v7 = vpop.permute.xlu1 %641  ;;  %v649_v4 = vadd.f32 %v636_v53, %v1586_v16  ;;  %v690_v2 = vadd.f32 0.0081, %v674_v60 }
 0x11c   : > { %960 = vrcp.f32 %v728_v61  ;;  %v727_v63 = vmul.f32 %v723_v19, %v707_v52  ;;  %v726_v36 = vadd.f32 0.0729, %v722_v18  ;;  %v721_v49 = vsub.f32 %v717_v23, %v685_v47 }
 0x11d   : > { %v656_v24 = vsub.f32 %v642_v7, %v634_v56  ;;  %v640_v28 = vpop.permute.xlu0 %639  ;;  %v652_v29 = vadd.f32 %v648_v57, %v642_v7  ;;  %v687_v47 = vadd.f32 0.0081, %v671_v40 }
 0x11e   : > { %962 = vrcp.f32 %v727_v63  ;;  %v730_v39 = vmul.f32 %v726_v36, %v710_v59  ;;  %v655_v11 = vsub.f32 %v640_v28, %v632_v37  ;;  %v725_v51 = vadd.f32 0.0729, %v721_v49 }
 0x11f   : > { %v660_v32 = vmul.f32 %v656_v24, %v1309_v9  ;;  %v646_v41 = vpop.permute.xlu1 %645  ;;  %v651_v10 = vadd.f32 %v647_v62, %v640_v28 }
 0x120   : > { %964 = vrcp.f32 %v730_v39  ;;  %v659_v43 = vmul.f32 %v655_v11, %v1309_v9  ;;  %v658_v45 = vsub.f32 %v646_v41, %v638_v55  ;;  %v729_v22 = vmul.f32 %v725_v51, %v709_v42 }
 0x121   : > { %v664_v13 = vadd.f32 %v660_v32, %v652_v29  ;;  %v644_v56 = vpop.permute.xlu0 %643  ;;  %v654_v3 = vadd.f32 %v650_v26, %v646_v41  ;;  %v673_v55 = vadd.f32 %v669_v5, %v669_v5 }
 0x122   : > { %v663_v46 = vadd.f32 %v659_v43, %v651_v10  ;;  %v662_v20 = vmul.f32 %v658_v45, %v1309_v9  ;;  %v657_v8 = vsub.f32 %v644_v56, %v636_v53  ;;  %966 = vrcp.f32 %v729_v22 }
 0x123   : > { %v692_v0 = vmul.f32 18.0, %v664_v13  ;;  %v653_v37 = vadd.f32 %v649_v4, %v644_v56  ;;  %v689_v28 = vadd.f32 0.0081, %v673_v55 }
 0x124   : > { %v691_v1 = vmul.f32 18.0, %v663_v46  ;;  %v666_v6 = vadd.f32 %v662_v20, %v654_v3  ;;  %v661_v27 = vmul.f32 %v657_v8, %v1309_v9 }
 0x125   : > { %v696_v17 = vsub.f32 %v692_v0, %v672_v44 }
 0x126   : > { %v961_v16 = vpop.eup %960  ;;  %v695_v38 = vsub.f32 %v691_v1, %v671_v40  ;;  %v694_v31 = vmul.f32 18.0, %v666_v6  ;;  %v665_v50 = vadd.f32 %v661_v27, %v653_v37 }
 0x127   : > { %v736_v12 = vmul.f32 %v961_v16, %v728_v61  ;;  %v700_v33 = vadd.f32 0.0729, %v696_v17 }
 0x128   : > { %v963_v54 = vpop.eup %962  ;;  %v698_v35 = vsub.f32 %v694_v31, %v674_v60  ;;  %v693_v30 = vmul.f32 18.0, %v665_v50  ;;  %v699_v21 = vadd.f32 0.0729, %v695_v38 }
 0x129   : > { %v740_v25 = vsub.f32 2.0, %v736_v12  ;;  %v735_v15 = vmul.f32 %v963_v54, %v727_v63  ;;  %v704_v48 = vmul.f32 %v700_v33, %v688_v34 }
 0x12a   : > { %v965_v14 = vpop.eup %964  ;;  %v697_v9 = vsub.f32 %v693_v30, %v673_v55  ;;  %v702_v18 = vadd.f32 0.0729, %v698_v35  ;;  %v703_v44 = vmul.f32 %v699_v21, %v687_v47 }
 0x12b   : > { %v739_v53 = vsub.f32 2.0, %v735_v15  ;;  %v738_v52 = vmul.f32 %v965_v14, %v730_v39  ;;  %v744_v19 = vmul.f32 %v961_v16, %v740_v25 }
 0x12c   : > { %v967_v23 = vpop.eup %966  ;;  %v701_v42 = vadd.f32 0.0729, %v697_v9  ;;  %v706_v24 = vmul.f32 %v702_v18, %v690_v2 }
 0x12d   : > { %v742_v61 = vsub.f32 2.0, %v738_v52  ;;  %v748_v7 = vmul.f32 %v744_v19, %v704_v48  ;;  %v743_v59 = vmul.f32 %v963_v54, %v739_v53  ;;  %v737_v36 = vmul.f32 %v967_v23, %v729_v22 }
 0x12e   : > { %v705_v29 = vmul.f32 %v701_v42, %v689_v28 }
 0x12f   : > { %v752_v49 = vsub.f32 1.0, %v748_v7  ;;  %v747_v57 = vmul.f32 %v743_v59, %v703_v44  ;;  %v746_v63 = vmul.f32 %v965_v14, %v742_v61  ;;  %v741_v62 = vsub.f32 2.0, %v737_v36 }
 0x131   : > { %v756_v11 = vmul.f32 0.5, %v752_v49  ;;  %v751_v51 = vsub.f32 1.0, %v747_v57  ;;  %v750_v39 = vmul.f32 %v746_v63, %v706_v24  ;;  %v745_v26 = vmul.f32 %v967_v23, %v741_v62 }
 0x133   : > { %v760_v32 = vmax.f32 %v756_v11, 0.0  ;;  %v755_v41 = vmul.f32 0.5, %v751_v51  ;;  %v754_v10 = vsub.f32 1.0, %v750_v39  ;;  %v749_v43 = vmul.f32 %v745_v26, %v705_v29 }
 0x135   : > { %v764_v45 = vmin.f32 %v760_v32, 1.0  ;;  %v759_v58 = vmax.f32 %v755_v41, 0.0  ;;  %v758_v22 = vmul.f32 0.5, %v754_v10  ;;  %v753_v4 = vsub.f32 1.0, %v749_v43 }
 0x137   : > { %768 = vst [vmem:[%s201_s6 + $0x8] sm:$0xff] %v764_v45  ;;  %v763_v13 = vmin.f32 %v759_v58, 1.0  ;;  %v762_v56 = vmax.f32 %v758_v22, 0.0  ;;  %v757_v46 = vmul.f32 0.5, %v753_v4 }
 0x139   : > { %767 = vst [vmem:[%s201_s6] sm:$0xff] %v763_v13  ;;  %v766_v3 = vmin.f32 %v762_v56, 1.0  ;;  %v761_v20 = vmax.f32 %v757_v46, 0.0 }
 0x13b   : > { %770 = vst [vmem:[%s201_s6 + $0x18] sm:$0xff] %v766_v3  ;;  %v765_v8 = vmin.f32 %v761_v20, 1.0 }
 0x13d   : > { %769 = vst [vmem:[%s201_s6 + $0x10] sm:$0xff] %v765_v8 }
 0x13e   : > { %1041 = shalt.err (!%p1038_p11)
}
 0x13f   : > { %s1042_s16 = scalar_lea.hbm %s1752_s26, 512  ;;  %s1046_s19 = scalar_lea.hbm %s1799_s2, 2048 }
 0x140   : > { %p1043_p7 = scmp.ne.s32.totalorder %s1752_s26, %s1042_s16  ;;  %p1047_p1 = scmp.lt.u32.totalorder %s1752_s26, %s1799_s2 }
 0x141   : > { %p1048_p3 = scmp.lt.u32.totalorder %s1046_s19, %s1042_s16  ;;  %p1050_p12 = scmp.lt.u32.totalorder %s1042_s16, %s1752_s26 }
 0x142   : > { %p1044_p8 = pnand %p1043_p7, %p1809_p0 }
 0x143   : > { %p1049_p6 = por %p1048_p3, %p1047_p1 }
 0x144   : > { %p1045_p13 = pneg %p1044_p8 }
 0x145   : > { %p1051_p2 = por %p1050_p12, %p1049_p6 }
 0x147   : > { %p1052_p9 = pnand %p1051_p2, %p1045_p13 }
 0x149   : > { %1055 = shalt.err (!%p1052_p9)
}
 0x14a   : > { %s1108_s20 = smov 128   ;;  %s1109_s5 = smov 8  }
 0x14b   : > { %906 = dma.vmem_to_hbm [thread:$0]  (%p1809_p0), %s1754_s17, 512, %s1752_s26, %s772_s27, %s1108_s20, %s1108_s20, %s1109_s5  }
 0x14c PF: > { %p920_p4 = scmp.ge.s32.totalorder %s1098_s12, 2  ;;  %s800_s6 = sand.u32 1, %s1086_s9  }
 0x14d   : > { %p1810_p5 = scmp.ne.s32.totalorder %s1805_s22, 0  ;;  %s801_s14 = scalar_lea.sflag [#allocation4], %s800_s6 }
 0x14f   : > { %p916_p10 = pnand %p920_p4, %p1810_p5 }
 0x151   : > { %1081 = dma.done.wait (!%p916_p10), %s801_s14, 512  }
 0x152   : > { %1083 = vsyncadd (!%p916_p10), %s801_s14, 4294966784  ;;  %p18_p11 = scmp.ge.s32.totalorder %s1150_s15, 6   ;;  %s1811_s9 = smov %s1090_s10 }
 0x153   : > { %s1812_s10 = smov %s1094_s11  ;;  %s1813_s11 = smov %s1162_s18 }
 0x154   : > { %s1814_s12 = smov %s1150_s15  ;;  %20 = sbr.rel (!%p18_p11) target bundleno = 7 (0x7), region = 86 }
 0x15b   :  { %806 = vsyncpa [#allocation3], 1 }
 0x15c   :  { %808 = vsyncpa [#allocation3 + $0x1], 1 }
 0x15d   :  { %809 = vsyncpa [#allocation6], 1 }
 0x15e   :  { %811 = vsyncpa [#allocation6 + $0x1], 1 }
 0x15f   :  { %812 = vsyncpa [#allocation4], 1 }
 0x160   :  { %814 = vsyncpa [#allocation4 + $0x1], 1 }

</bundles_post_ra>
